<compile_context>
chip_gen: v7x
topology: tpu7x:2x2x1
jax: 0.10.0
libtpu: 0.0.40
codegen_flags: <defaults>
</compile_context>

<pallas_src>
import functools

import jax
import jax.numpy as jnp
from jax import lax
from jax.experimental import pallas as pl
from jax.experimental.pallas import tpu as pltpu


def _round_up(n, m):
    return ((n + m - 1) // m) * m


# ----------------------------- kernels --------------------------------------

def _logits_t(x, w, b):
    # x: (TN, H) native dtype, w: (L, H) same dtype, b: (L, 1) f32
    # returns f32 logits laid out lane-dense: (L, TN)
    lt = jnp.einsum("lh,nh->ln", w, x, preferred_element_type=jnp.float32)
    return lt + b


def _logits_kernel(x_ref, w_ref, b_ref, lt_ref):
    lt_ref[...] = _logits_t(x_ref[...], w_ref[...], b_ref[...]).astype(lt_ref.dtype)


def _fused_kernel(x_ref, w_ref, b_ref, eff_ref, *out_refs,
                  n_valid, tile_n, emit_logits):
    # x: (TN, H), w: (L, H), b: (L, 1) f32, eff: (1, TN) i32 (mask already merged; -100 = ignore)
    if emit_logits:
        lt_ref, num_ref, den_ref = out_refs
    else:
        num_ref, den_ref = out_refs

    lt = _logits_t(x_ref[...], w_ref[...], b_ref[...])            # (L, TN) f32
    if emit_logits:
        lt_ref[...] = lt.astype(lt_ref.dtype)

    eff = eff_ref[...]                                            # (1, TN) i32
    l, tn = lt.shape

    # Ragged-tail handling: tokens whose global index >= N never contribute
    # (the last tile's x rows past N may be garbage read past the array end).
    col = pl.program_id(0) * tile_n + lax.broadcasted_iota(jnp.int32, (1, tn), 1)
    valid = jnp.logical_and(col < n_valid, eff >= 0)              # (1, TN)

    # numerically stable log-softmax over the label axis (sublanes)
    m = jnp.max(lt, axis=0, keepdims=True)                        # (1, TN)
    shifted = lt - m
    lse = jnp.log(jnp.sum(jnp.exp(shifted), axis=0, keepdims=True))
    logp = shifted - lse                                          # (L, TN)

    # gather log p[label] via one-hot compare (no dynamic gather on TPU)
    row = lax.broadcasted_iota(jnp.int32, (l, tn), 0)
    onehot = row == eff                                           # (L, TN)
    nll = -jnp.sum(jnp.where(onehot, logp, 0.0), axis=0, keepdims=True)   # (1, TN)

    num_p = jnp.sum(jnp.where(valid, nll, 0.0), axis=1, keepdims=True)    # (1, 1)
    den_p = jnp.sum(valid.astype(jnp.float32), axis=1, keepdims=True)     # (1, 1)

    # Tiny (1, 1, 128) partial slabs (lane-dense, legal block shape).
    num_ref[...] = jnp.broadcast_to(num_p.reshape(1, 1, 1), num_ref.shape)
    den_ref[...] = jnp.broadcast_to(den_p.reshape(1, 1, 1), den_ref.shape)


# ----------------------------- wrapper ---------------------------------------

def token_classification_head(sequence_output, weight, bias, pooled_output=None,
                              labels=None, attention_mask=None, *,
                              tile_n=1024, return_logits=True):
    """sequence_output: [B,S,H]; weight: [L,H]; bias: [L].
    Returns (logits [B,S,L] or None, loss scalar or None).
    pooled_output is accepted for signature fidelity and ignored (as in the module)."""
    del pooled_output
    B, S, H = sequence_output.shape
    L = weight.shape[0]
    N = B * S
    out_dtype = sequence_output.dtype

    x = sequence_output.reshape(N, H)               # native dtype, no pad, no copy
    # NOTE: weights are kept in the activation dtype (identical for f32 inputs;
    # an intentional choice when activations are bf16).
    w = weight.astype(x.dtype)                      # (L, H)
    b = bias.reshape(L, 1).astype(jnp.float32)      # (L, 1)

    # Tile selection: single full-extent tile for small N, otherwise a multiple
    # of 128 so labels/logits lane-dim stores are unmasked.
    if N <= tile_n:
        tn, num_tiles = N, 1
    else:
        tn = _round_up(min(tile_n, N), 128)
        num_tiles = pl.cdiv(N, tn)
    grid = (num_tiles,)

    xb = jnp.dtype(x.dtype).itemsize
    ob = jnp.dtype(out_dtype).itemsize

    # VMEM budget: double-buffered x tile + resident weight + logits tile + small.
    vmem_est = (2 * tn * H * xb + 2 * L * H * xb + 2 * L * 4 + 2 * tn * 4
                + 2 * L * tn * ob + 4 * 128 * 4 + (2 << 20))
    vmem_limit = int(min(max(vmem_est, 32 * 1024 * 1024), 64 * 1024 * 1024))

    params = pltpu.CompilerParams(dimension_semantics=("parallel",),
                                  vmem_limit_bytes=vmem_limit)

    x_spec = pl.BlockSpec((tn, H), lambda i: (i, 0))
    w_spec = pl.BlockSpec((L, H), lambda i: (0, 0))      # resident across the grid
    b_spec = pl.BlockSpec((L, 1), lambda i: (0, 0))      # resident across the grid
    lt_spec = pl.BlockSpec((L, tn), lambda i: (0, i))    # lane-dense logits output
    tok_spec = pl.BlockSpec((1, tn), lambda i: (0, i))
    part_spec = pl.BlockSpec((1, 1, 128), lambda i: (i, 0, 0))

    if labels is None:
        cost = pl.CostEstimate(flops=2 * N * H * L, transcendentals=0,
                               bytes_accessed=N * H * xb + L * H * xb + L * N * ob)
        logits_t = pl.pallas_call(
            _logits_kernel,
            out_shape=jax.ShapeDtypeStruct((L, N), out_dtype),
            grid=grid,
            in_specs=[x_spec, w_spec, b_spec],
            out_specs=lt_spec,
            compiler_params=params,
            cost_estimate=cost,
        )(x, w, b)
        return logits_t.T.reshape(B, S, L), None

    # Pre-merge mask into labels: single (1, N) i32 input stream, -100 == ignore.
    eff = labels.reshape(1, N).astype(jnp.int32)
    if attention_mask is not None:
        eff = jnp.where(attention_mask.reshape(1, N) == 1, eff, -100)

    kernel = functools.partial(_fused_kernel, n_valid=N, tile_n=tn,
                               emit_logits=return_logits)

    part_shape = jax.ShapeDtypeStruct((num_tiles, 1, 128), jnp.float32)
    if return_logits:
        out_shape = (jax.ShapeDtypeStruct((L, N), out_dtype), part_shape, part_shape)
        out_specs = (lt_spec, part_spec, part_spec)
    else:
        out_shape = (part_shape, part_shape)
        out_specs = (part_spec, part_spec)

    cost = pl.CostEstimate(
        flops=2 * N * H * L,
        transcendentals=N * L,
        bytes_accessed=N * H * xb + L * H * xb + 4 * N
                       + (L * N * ob if return_logits else 0))

    outs = pl.pallas_call(
        kernel,
        out_shape=out_shape,
        grid=grid,
        in_specs=[x_spec, w_spec, b_spec, tok_spec],
        out_specs=out_specs,
        compiler_params=params,
        cost_estimate=cost,
    )(x, w, b, eff)

    if return_logits:
        logits_t, num_p, den_p = outs
        logits = logits_t.T.reshape(B, S, L)
    else:
        num_p, den_p = outs
        logits = None

    # Finish the masked mean outside the kernel (keeps the grid axis parallel).
    num = jnp.sum(num_p[:, 0, 0])
    den = jnp.sum(den_p[:, 0, 0])
    loss = num / den    # NaN if no active token, matching PyTorch CrossEntropyLoss
    return logits, loss


# ----------------------------- reference -------------------------------------

def _reference(sequence_output, weight, bias, labels=None, attention_mask=None):
    x = sequence_output.astype(jnp.float32)
    logits = jnp.einsum("bsh,lh->bsl", x, weight.astype(jnp.float32)) + bias.astype(jnp.float32)
    loss = None
    if labels is not None:
        L = weight.shape[0]
        lf = logits.reshape(-1, L)
        lab = labels.reshape(-1).astype(jnp.int32)
        if attention_mask is not None:
            lab = jnp.where(attention_mask.reshape(-1) == 1, lab, -100)
        valid = lab >= 0
        logp = jax.nn.log_softmax(lf, axis=-1)
        safe = jnp.where(valid, lab, 0)
        nll = -jnp.take_along_axis(logp, safe[:, None], axis=-1)[:, 0]
        loss = jnp.sum(jnp.where(valid, nll, 0.0)) / jnp.sum(valid.astype(jnp.float32))
    return logits, loss


# ----------------------------- main -------------------------------------------

if __name__ == "__main__":
    key = jax.random.PRNGKey(0)

    # ---- small shapes consistent with the module's forward ------------------
    B, S, H, NUM_LABELS = 2, 8, 32, 5
    k_x, k_w, k_lab, k_mask = jax.random.split(key, 4)

    sequence_output = jax.random.normal(k_x, (B, S, H), dtype=jnp.float32)
    pooled_output = jnp.zeros((B, H), dtype=jnp.float32)   # unused by this head

    # deterministic parameter init matching _init_weights(): N(0, 0.02), bias = 0
    weight = 0.02 * jax.random.normal(k_w, (NUM_LABELS, H), dtype=jnp.float32)
    bias = jnp.zeros((NUM_LABELS,), dtype=jnp.float32)

    labels = jax.random.randint(k_lab, (B, S), 0, NUM_LABELS, dtype=jnp.int32)
    attention_mask = (jax.random.uniform(k_mask, (B, S)) > 0.25).astype(jnp.int32)
    attention_mask = attention_mask.at[0, 0].set(1)        # >= 1 active token

    logits, loss = token_classification_head(
        sequence_output, weight, bias, pooled_output,
        labels=labels, attention_mask=attention_mask)
    jax.block_until_ready(logits)
    jax.block_until_ready(loss)
    assert logits.shape == (B, S, NUM_LABELS)
    assert loss.shape == ()

    ref_logits, ref_loss = _reference(
        sequence_output, weight, bias, labels=labels, attention_mask=attention_mask)
    assert jnp.allclose(logits, ref_logits, atol=1e-4, rtol=1e-4)
    assert jnp.allclose(loss, ref_loss, atol=1e-4, rtol=1e-4)

    # logits-only path (labels=None)
    logits_only, no_loss = token_classification_head(sequence_output, weight, bias)
    jax.block_until_ready(logits_only)
    assert no_loss is None
    assert jnp.allclose(logits_only, ref_logits, atol=1e-4, rtol=1e-4)

    # loss-only path (skips the logits HBM writeback + wrapper transpose)
    none_logits, loss_only = token_classification_head(
        sequence_output, weight, bias,
        labels=labels, attention_mask=attention_mask, return_logits=False)
    jax.block_until_ready(loss_only)
    assert none_logits is None
    assert jnp.allclose(loss_only, ref_loss, atol=1e-4, rtol=1e-4)

    # ---- larger run exercising multiple tiles + ragged (un-padded) tail -----
    B2, S2 = 2, 100                       # N=200, tile_n=128 -> 2 tiles, last one ragged
    k_x2, k_lab2, k_mask2 = jax.random.split(jax.random.PRNGKey(1), 3)
    seq2 = jax.random.normal(k_x2, (B2, S2, H), dtype=jnp.float32)
    lab2 = jax.random.randint(k_lab2, (B2, S2), 0, NUM_LABELS, dtype=jnp.int32)
    msk2 = (jax.random.uniform(k_mask2, (B2, S2)) > 0.25).astype(jnp.int32)
    msk2 = msk2.at[0, 0].set(1)

    logits2, loss2 = token_classification_head(
        seq2, weight, bias, labels=lab2, attention_mask=msk2, tile_n=128)
    jax.block_until_ready(logits2)
    jax.block_until_ready(loss2)
    ref_logits2, ref_loss2 = _reference(seq2, weight, bias, labels=lab2, attention_mask=msk2)
    assert jnp.allclose(logits2, ref_logits2, atol=1e-4, rtol=1e-4)
    assert jnp.allclose(loss2, ref_loss2, atol=1e-4, rtol=1e-4)

    # ragged multi-tile, loss-only
    _, loss2b = token_classification_head(
        seq2, weight, bias, labels=lab2, attention_mask=msk2,
        tile_n=128, return_logits=False)
    jax.block_until_ready(loss2b)
    assert jnp.allclose(loss2b, ref_loss2, atol=1e-4, rtol=1e-4)

    print("KERNEL_OK")
</pallas_src>

<mosaic_0001>
module attributes {stable_mosaic.version = 11 : i64} {
  func.func @_fused_kernel(%arg0: i32, %arg1: memref<16x32xf32, #tpu.memory_space<vmem>>, %arg2: memref<5x32xf32, #tpu.memory_space<vmem>>, %arg3: memref<5x1xf32, #tpu.memory_space<vmem>>, %arg4: memref<1x16xi32, #tpu.memory_space<vmem>>, %arg5: memref<5x16xf32, #tpu.memory_space<vmem>>, %arg6: memref<1x1x128xf32, #tpu.memory_space<vmem>>, %arg7: memref<1x1x128xf32, #tpu.memory_space<vmem>>) attributes {dimension_semantics = [#tpu.dimension_semantics<parallel>], iteration_bounds = array<i64: 1>, scalar_prefetch = 0 : i64, scratch_operands = 0 : i64, tpu.core_type = #tpu.core_type<tc>, window_params = [{transform_indices = @transform_0, window_bounds = array<i64: 16, 32>}, {pipeline_mode = #tpu.pipeline_mode<synchronous>, transform_indices = @transform_1, window_bounds = array<i64: 5, 32>}, {pipeline_mode = #tpu.pipeline_mode<synchronous>, transform_indices = @transform_2, window_bounds = array<i64: 5, 1>}, {transform_indices = @transform_3, window_bounds = array<i64: 1, 16>}, {transform_indices = @transform_4, window_bounds = array<i64: 5, 16>}, {transform_indices = @transform_5, window_bounds = array<i64: 1, 1, 128>}, {transform_indices = @transform_6, window_bounds = array<i64: 1, 1, 128>}]} {
    %c0 = arith.constant 0 : index
    %c0_0 = arith.constant 0 : index
    %0 = vector.load %arg1[%c0, %c0_0] : memref<16x32xf32, #tpu.memory_space<vmem>>, vector<16x32xf32>
    %c0_1 = arith.constant 0 : index
    %c0_2 = arith.constant 0 : index
    %1 = vector.load %arg2[%c0_1, %c0_2] : memref<5x32xf32, #tpu.memory_space<vmem>>, vector<5x32xf32>
    %c0_3 = arith.constant 0 : index
    %c0_4 = arith.constant 0 : index
    %2 = vector.load %arg3[%c0_3, %c0_4] : memref<5x1xf32, #tpu.memory_space<vmem>>, vector<5x1xf32>
    "tpu.trace_start"() <{level = 10 : i32, message = "lh,nh->ln"}> : () -> ()
    %cst = arith.constant dense<0.000000e+00> : vector<5x16xf32>
    %3 = tpu.matmul %1, %0, %cst {dimension_numbers = #tpu.dot_dimension_numbers<[1], [1], [0], [0], [0, 0, 1, 0], [], []>} : vector<5x32xf32>, vector<16x32xf32>, vector<5x16xf32> -> vector<5x16xf32>
    "tpu.trace_stop"() : () -> ()
    %4 = vector.broadcast %2 : vector<5x1xf32> to vector<5x16xf32>
    %5 = arith.addf %3, %4 : vector<5x16xf32>
    %c0_5 = arith.constant 0 : index
    %c0_6 = arith.constant 0 : index
    %6 = vector.load %arg5[%c0_5, %c0_6] : memref<5x16xf32, #tpu.memory_space<vmem>>, vector<5x16xf32>
    tpu.vector_store %arg5[%c0_5, %c0_6], %5 {strides = array<i32>} : memref<5x16xf32, #tpu.memory_space<vmem>>, vector<5x16xf32>,
    %c0_7 = arith.constant 0 : index
    %c0_8 = arith.constant 0 : index
    %7 = vector.load %arg4[%c0_7, %c0_8] : memref<1x16xi32, #tpu.memory_space<vmem>>, vector<1x16xi32>
    %c16_i32 = arith.constant 16 : i32
    %8 = arith.muli %arg0, %c16_i32 : i32
    %9 = tpu.iota {dimensions = array<i32: 1>} : vector<1x16xi32>
    %10 = vector.broadcast %8 : i32 to vector<1x16xi32>
    %11 = arith.addi %10, %9 : vector<1x16xi32>
    %c16_i32_9 = arith.constant 16 : i32
    %12 = vector.broadcast %c16_i32_9 : i32 to vector<1x16xi32>
    %13 = arith.cmpi slt, %11, %12 : vector<1x16xi32>
    %c0_i32 = arith.constant 0 : i32
    %14 = vector.broadcast %c0_i32 : i32 to vector<1x16xi32>
    %15 = arith.cmpi sge, %7, %14 : vector<1x16xi32>
    %16 = arith.andi %13, %15 : vector<1x16xi1>
    %cst_10 = arith.constant dense<0xFF800000> : vector<16xf32>
    %17 = vector.multi_reduction <maximumf>, %5, %cst_10 [0] : vector<5x16xf32> to vector<16xf32>
    %18 = vector.shape_cast %17 : vector<16xf32> to vector<1x16xf32>
    %19 = vector.broadcast %18 : vector<1x16xf32> to vector<5x16xf32>
    %20 = arith.subf %5, %19 : vector<5x16xf32>
    %21 = math.exp %20 : vector<5x16xf32>
    %cst_11 = arith.constant dense<0.000000e+00> : vector<16xf32>
    %22 = vector.multi_reduction <add>, %21, %cst_11 [0] : vector<5x16xf32> to vector<16xf32>
    %23 = vector.shape_cast %22 : vector<16xf32> to vector<1x16xf32>
    %24 = math.log %23 : vector<1x16xf32>
    %25 = vector.broadcast %24 : vector<1x16xf32> to vector<5x16xf32>
    %26 = arith.subf %20, %25 : vector<5x16xf32>
    %27 = tpu.iota {dimensions = array<i32: 0>} : vector<5x16xi32>
    %28 = vector.broadcast %7 : vector<1x16xi32> to vector<5x16xi32>
    %29 = arith.cmpi eq, %27, %28 : vector<5x16xi32>
    %cst_12 = arith.constant 0.000000e+00 : f32
    %30 = vector.broadcast %cst_12 : f32 to vector<5x16xf32>
    %31 = arith.select %29, %26, %30 : vector<5x16xi1>, vector<5x16xf32>
    %cst_13 = arith.constant dense<0.000000e+00> : vector<16xf32>
    %32 = vector.multi_reduction <add>, %31, %cst_13 [0] : vector<5x16xf32> to vector<16xf32>
    %33 = vector.shape_cast %32 : vector<16xf32> to vector<1x16xf32>
    %cst_14 = arith.constant 0.000000e+00 : f32
    %34 = vector.broadcast %cst_14 : f32 to vector<1x16xf32>
    %35 = arith.subf %34, %33 : vector<1x16xf32>
    %cst_15 = arith.constant 0.000000e+00 : f32
    %36 = vector.broadcast %cst_15 : f32 to vector<1x16xf32>
    %37 = arith.select %16, %35, %36 : vector<1x16xi1>, vector<1x16xf32>
    %cst_16 = arith.constant dense<0.000000e+00> : vector<1xf32>
    %38 = vector.multi_reduction <add>, %37, %cst_16 [1] : vector<1x16xf32> to vector<1xf32>
    %39 = vector.shape_cast %38 : vector<1xf32> to vector<1x1xf32>
    %40 = arith.extui %16 : vector<1x16xi1> to vector<1x16xi32>
    %41 = arith.sitofp %40 : vector<1x16xi32> to vector<1x16xf32>
    %cst_17 = arith.constant dense<0.000000e+00> : vector<1xf32>
    %42 = vector.multi_reduction <add>, %41, %cst_17 [1] : vector<1x16xf32> to vector<1xf32>
    %43 = vector.shape_cast %42 : vector<1xf32> to vector<1x1xf32>
    %44 = vector.shape_cast %39 : vector<1x1xf32> to vector<1x1x1xf32>
    %45 = vector.shape_cast %44 : vector<1x1x1xf32> to vector<1x1x1xf32>
    %46 = vector.broadcast %45 : vector<1x1x1xf32> to vector<1x1x128xf32>
    %c0_18 = arith.constant 0 : index
    %c0_19 = arith.constant 0 : index
    %c0_20 = arith.constant 0 : index
    %47 = vector.load %arg6[%c0_18, %c0_19, %c0_20] : memref<1x1x128xf32, #tpu.memory_space<vmem>>, vector<1x1x128xf32>
    tpu.vector_store %arg6[%c0_18, %c0_19, %c0_20], %46 {strides = array<i32>} : memref<1x1x128xf32, #tpu.memory_space<vmem>>, vector<1x1x128xf32>,
    %48 = vector.shape_cast %43 : vector<1x1xf32> to vector<1x1x1xf32>
    %49 = vector.shape_cast %48 : vector<1x1x1xf32> to vector<1x1x1xf32>
    %50 = vector.broadcast %49 : vector<1x1x1xf32> to vector<1x1x128xf32>
    %c0_21 = arith.constant 0 : index
    %c0_22 = arith.constant 0 : index
    %c0_23 = arith.constant 0 : index
    %51 = vector.load %arg7[%c0_21, %c0_22, %c0_23] : memref<1x1x128xf32, #tpu.memory_space<vmem>>, vector<1x1x128xf32>
    tpu.vector_store %arg7[%c0_21, %c0_22, %c0_23], %50 {strides = array<i32>} : memref<1x1x128xf32, #tpu.memory_space<vmem>>, vector<1x1x128xf32>,
    return
  }
  func.func @transform_0(%arg0: i32) -> (i32, i32) {
    %c0_i32 = arith.constant 0 : i32
    %c0_i32_0 = arith.constant 0 : i32
    return %arg0, %c0_i32 : i32, i32
  }
  func.func @transform_1(%arg0: i32) -> (i32, i32) {
    %c0_i32 = arith.constant 0 : i32
    %c0_i32_0 = arith.constant 0 : i32
    %c0_i32_1 = arith.constant 0 : i32
    return %c0_i32, %c0_i32_0 : i32, i32
  }
  func.func @transform_2(%arg0: i32) -> (i32, i32) {
    %c0_i32 = arith.constant 0 : i32
    %c0_i32_0 = arith.constant 0 : i32
    %c0_i32_1 = arith.constant 0 : i32
    return %c0_i32, %c0_i32_0 : i32, i32
  }
  func.func @transform_3(%arg0: i32) -> (i32, i32) {
    %c0_i32 = arith.constant 0 : i32
    %c0_i32_0 = arith.constant 0 : i32
    return %c0_i32, %arg0 : i32, i32
  }
  func.func @transform_4(%arg0: i32) -> (i32, i32) {
    %c0_i32 = arith.constant 0 : i32
    %c0_i32_0 = arith.constant 0 : i32
    return %c0_i32, %arg0 : i32, i32
  }
  func.func @transform_5(%arg0: i32) -> (i32, i32, i32) {
    %c0_i32 = arith.constant 0 : i32
    %c0_i32_0 = arith.constant 0 : i32
    %c0_i32_1 = arith.constant 0 : i32
    return %arg0, %c0_i32, %c0_i32_0 : i32, i32, i32
  }
  func.func @transform_6(%arg0: i32) -> (i32, i32, i32) {
    %c0_i32 = arith.constant 0 : i32
    %c0_i32_0 = arith.constant 0 : i32
    %c0_i32_1 = arith.constant 0 : i32
    return %arg0, %c0_i32, %c0_i32_0 : i32, i32, i32
  }
}

</mosaic_0001>

<bundles_post_ra>
// kernel: tpu_custom_call.1
= control target key start
LH: loop header
LB: loop body
LE: loop exit
PB: predicated region body
PF: predicated region fallthrough
CT: control target
= control target key end

     0   :  { %12 = vsyncpa [#allocation3], 0  ;;  %s478_s0 = inlined_call_operand.hbm [shape: f32[16,32], index: 0, kind: input, shape index: {}]   ;;  %s479_s1 = inlined_call_operand.vmem [shape: f32[5,32], index: 1, kind: input, shape index: {}]   ;;  %s480_s2 = inlined_call_operand.vmem [shape: f32[5,1], index: 2, kind: input, shape index: {}]   ;;  %s481_s3 = inlined_call_operand.vmem [shape: s32[1,16], index: 3, kind: input, shape index: {}]   ;;  %s482_s4 = inlined_call_operand.hbm [shape: f32[5,16], index: 4, kind: output, shape index: {0}]   ;;  %s483_s5 = inlined_call_operand.hbm [shape: f32[1,1,128], index: 5, kind: output, shape index: {1}]   ;;  %s484_s6 = inlined_call_operand.hbm [shape: f32[1,1,128], index: 6, kind: output, shape index: {2}]  }
   0x1   :  { %13 = vsyncpa [#allocation4], 0 }
   0x2   :  { %14 = vsyncpa [#allocation7], 0  ;;  %s353_s21 = smov [#allocation2]   ;;  %s259_s25 = scalar_lea.hbm %s478_s0, 256 }
   0x3   :  { %s20_s22 = sshll.u32 %s353_s21, 4  ;;  %p260_p0 = scmp.ne.s32.totalorder %s478_s0, %s259_s25  ;;  %s21_s22 = int_to_ptr.vmem [resolvable:$true] %s20_s22 }
   0x4   :  { %p263_p1 = scmp.lt.u32.totalorder %s259_s25, %s478_s0 }
   0x6   :  { %p265_p2 = pnand %p263_p1, %p260_p0 }
   0x8   :  { %268 = shalt.err (!%p265_p2)
}
   0x9   :  { %s269_s30 = scalar_lea.vmem %s21_s22, 256  ;;  %p274_p4 = scmp.lt.s32.totalorder %s21_s22, %s21_s22 }
   0xa   :  { %p270_p3 = scmp.ne.s32.totalorder %s21_s22, %s269_s30  ;;  %p275_p5 = scmp.lt.s32.totalorder %s269_s30, %s269_s30 }
   0xc   :  { %p276_p6 = por %p275_p5, %p274_p4 }
   0xe   :  { %p277_p7 = pnand %p276_p6, %p270_p3 }
  0x10   :  { %280 = shalt.err (!%p277_p7)
}
  0x11   :  { %s354_s7 = smov 128   ;;  %s355_s8 = smov 8  }
  0x12   :  { %26 = dma.hbm_to_vmem [thread:$0]  %s478_s0, 256, %s21_s22, [#allocation3], %s354_s7, %s354_s7, %s355_s8  }
  0x13   :  { %347 = dma.done.wait [#allocation3], 256  }
  0x14   :  { %348 = vsyncadd [#allocation3], 4294967040  ;;  %v356_v0 = vmov 0.0|0.0   ;;  %vm357_vm0 = vmmov 0   ;;  %v358_v1 = vmov 0.0   ;;  %v359_v2 = vmov 0  }
  0x15   :  { %240 = vmatprep.subr.bf16.mxu0 %v356_v0  ;;  %237 = vmatprep.mubr.msk.f32.mxu0 %vm357_vm0, %v358_v1  ;;  %vm45_vm1 = vcmask 261120   ;;  %v36_v3 = vld [vmem:[#allocation2] sm:$0xff]  ;;  %v37_v4 = vld [vmem:[#allocation2 + $0x8] sm:$0xff]  ;;  %v129_v8 = vlaneseq  ;;  %vm173_vm7 = vcmask 122880   ;;  %vm125_vm8 = vcmask 126976  }
  0x16   :  { %254 = vset.pattern.permute.xlu0 %v359_v2  ;;  %vm242_vm2 = vmpackc.low %vm45_vm1, %vm45_vm1  ;;  %v241_v5 = vpack.c.bf16 %v37_v4, %v36_v3  ;;  %v39_v6 = vld [vmem:[%s480_s2] sm:$0x1f] }
  0x17   :  { %42 = vperm.xlu0 %254, %v39_v6   ;;  %v38_v7 = vld [vmem:[%s479_s1] sm:$0x1f]  ;;  %v157_v9 = vshrl.u32 %v129_v8, 7  ;;  %v130_v13 = vand.u32 127, %v129_v8  ;;  %s360_s1 = smov [#allocation5]  }
  0x18   :  { %243 = vmatpush3.bf16.xpose.msk.msra.mxu0 %vm242_vm2, %v241_v5  ;;  %v127_v11 = vld [vmem:[%s481_s3] sm:$0x1]  ;;  %s190_s2 = sshll.u32 %s360_s1, 4  ;;  %s191_s2 = int_to_ptr.vmem [resolvable:$true] %s190_s2 }
  0x19   :  { %v160_v10 = vsub.s32 0, %v157_v9  ;;  %vm133_vm4 = vcmp.lt.s32.totalorder %v130_v13, 16  ;;  %vm134_vm5 = vcmp.ge.s32.totalorder %v127_v11, 0  ;;  %s281_s3 = scalar_lea.vmem %s191_s2, 128  ;;  %p286_p9 = scmp.lt.s32.totalorder %s191_s2, %s191_s2 }
  0x1a   :  { %vm419_vm6 = vmand %vm133_vm4, %vm134_vm5  ;;  %p282_p8 = scmp.ne.s32.totalorder %s191_s2, %s281_s3  ;;  %p287_p10 = scmp.lt.s32.totalorder %s281_s3, %s281_s3 }
  0x1b   :  { %v161_v12 = vrot.slane %v127_v11, %v160_v10  ;;  %v229_v15 = vsel %vm419_vm6, 1.0, %v358_v1 }
  0x1c   :  { %v179_v16 = vsel %vm173_vm7, %v229_v15, 0.0  ;;  %p288_p11 = por %p287_p10, %p286_p9 }
  0x1d   :  { %vm162_vm3 = vcmp.eq.s32.totalorder %v157_v9, %v161_v12  ;;  %180 = vadd.xlane.f32.xlu1 %v179_v16 }
  0x1e   :  { %p289_p12 = pnand %p288_p11, %p282_p8 }
  0x1f   :  { %238 = vmatmul.mubr.msk.f32.vlgmr.msra.gmra.mrb[0].mxu0 %vm45_vm1, %v38_v7 }
  0x96   :  { %v43_v17 = vpop.permute.xlu0 %42 }
  0xaa   :  { %v181_v52 = vpop.xlane.xlu1 %180 }
  0xab   :  { %183 = vst [vmem:[#allocation8] sm:$0x1] %v181_v52 }
  0xf2   :  { %v121_v18 = vpop.f32.mrb[0].mxu0 }
  0xf3   :  { %v122_v19 = vadd.f32 %v121_v18, %v43_v17  ;;  %v239_v20 = vpop.f32.mrb[1].mxu0 }
  0xf5   :  { %v136_v21 = vsel %vm125_vm8, %v122_v19, -inf  ;;  %126 = vst.msk [vmem:[#allocation5] sm:$0x1f] %vm125_vm8, %v122_v19 }
  0xf6   :  { %v137_v22 = vrot.slane %v136_v21, 4 }
  0xf8   :  { %v138_v23 = vmax.f32 %v136_v21, %v137_v22 }
  0xfa   :  { %v139_v24 = vrot.slane %v138_v23, 2 }
  0xfc   :  { %v140_v25 = vmax.f32 %v138_v23, %v139_v24 }
  0xfe   :  { %v141_v26 = vrot.slane %v140_v25, 1 }
 0x100   :  { %v142_v27 = vmax.f32 %v140_v25, %v141_v26 }
 0x102   :  { %v143_v28 = vsub.f32 %v122_v19, %v142_v27 }
 0x104   :  { %v144_v29 = vmul.f32 1.442695, %v143_v28 }
 0x106   :  { %255 = vpow2.f32 %v144_v29 }
 0x110   :  { %v256_v30 = vpop.eup %255 }
 0x111   :  { %v146_v31 = vsel %vm125_vm8, %v256_v30, 0.0 }
 0x112   :  { %v147_v32 = vrot.slane %v146_v31, 4 }
 0x114   :  { %v148_v33 = vadd.f32 %v147_v32, %v146_v31 }
 0x116   :  { %v149_v34 = vrot.slane %v148_v33, 2 }
 0x118   :  { %v150_v35 = vadd.f32 %v149_v34, %v148_v33 }
 0x11a   :  { %v151_v36 = vrot.slane %v150_v35, 1 }
 0x11c   :  { %v152_v37 = vadd.f32 %v151_v36, %v150_v35 }
 0x11e   :  { %257 = vlog2.f32 %v152_v37 }
 0x128   :  { %v258_v38 = vpop.eup %257 }
 0x129   :  { %v154_v39 = vmul.f32 0.6931472, %v258_v38 }
 0x12b   :  { %v155_v40 = vsub.f32 %v143_v28, %v154_v39 }
 0x12d   :  { %v163_v41 = vsel %vm162_vm3, %v155_v40, 0.0 }
 0x12e   :  { %v164_v42 = vsel %vm125_vm8, %v163_v41, 0.0 }
 0x12f   :  { %v165_v43 = vrot.slane %v164_v42, 4 }
 0x131   :  { %v166_v44 = vadd.f32 %v165_v43, %v164_v42 }
 0x133   :  { %v167_v45 = vrot.slane %v166_v44, 2 }
 0x135   :  { %v168_v46 = vadd.f32 %v167_v45, %v166_v44 }
 0x137   :  { %v169_v47 = vrot.slane %v168_v46, 1 }
 0x139   :  { %v170_v48 = vadd.f32 %v169_v47, %v168_v46 }
 0x13b   :  { %v171_v49 = vsub.f32 0.0, %v170_v48 }
 0x13d   :  { %v172_v50 = vsel %vm419_vm6, %v171_v49, 0.0 }
 0x13e   :  { %v174_v51 = vsel %vm173_vm7, %v172_v50, 0.0 }
 0x13f   :  { %175 = vadd.xlane.f32.xlu0 %v174_v51 }
 0x140   :  { %292 = shalt.err (!%p289_p12)
}
 0x141   :  { %s293_s18 = scalar_lea.hbm %s482_s4, 128 }
 0x142   :  { %p294_p13 = scmp.ne.s32.totalorder %s482_s4, %s293_s18  ;;  %p297_p0 = scmp.lt.u32.totalorder %s293_s18, %s482_s4 }
 0x144   :  { %p299_p1 = pnand %p297_p0, %p294_p13 }
 0x146   :  { %302 = shalt.err (!%p299_p1)
}
 0x147   :  { %193 = dma.vmem_to_hbm [thread:$0]  %s191_s2, 128, %s482_s4, [#allocation4]  }
 0x148   :  { %s361_s25 = smov [#allocation6]   ;;  %s362_s27 = smov [#allocation8]  }
 0x149   :  { %s200_s26 = sshll.u32 %s361_s25, 4  ;;  %s210_s28 = sshll.u32 %s362_s27, 4  ;;  %s201_s26 = int_to_ptr.vmem [resolvable:$true] %s200_s26  ;;  %s446_s28 = int_to_ptr.vmem [resolvable:$true] %s210_s28 }
 0x14a   :  { %s303_s29 = scalar_lea.vmem %s201_s26, 16  ;;  %s307_s30 = scalar_lea.vmem %s201_s26, 32 }
 0x14b   :  { %p304_p2 = scmp.ne.s32.totalorder %s201_s26, %s303_s29  ;;  %p308_p3 = scmp.lt.s32.totalorder %s201_s26, %s201_s26 }
 0x14c   :  { %p309_p4 = scmp.lt.s32.totalorder %s307_s30, %s303_s29 }
 0x14e   :  { %p310_p5 = por %p309_p4, %p308_p3 }
 0x150   :  { %p311_p6 = pnand %p310_p5, %p304_p2 }
 0x1cc   :  { %v176_v53 = vpop.xlane.xlu0 %175 }
 0x1cd   :  { %182 = vst [vmem:[#allocation6] sm:$0x1] %v176_v53 }
 0x1ce   :  { %314 = shalt.err (!%p311_p6)
}
 0x1cf   :  { %s315_s4 = scalar_lea.hbm %s483_s5, 16 }
 0x1d0   :  { %p316_p7 = scmp.ne.s32.totalorder %s483_s5, %s315_s4  ;;  %p319_p8 = scmp.lt.u32.totalorder %s315_s4, %s483_s5 }
 0x1d2   :  { %p321_p9 = pnand %p319_p8, %p316_p7 }
 0x1d4   :  { %324 = shalt.err (!%p321_p9)
}
 0x1d5   :  { %203 = dma.vmem_to_hbm [thread:$0]  %s201_s26, 16, %s483_s5, [#allocation7]  }
 0x1d6   :  { %s325_s14 = scalar_lea.vmem %s446_s28, 16  ;;  %s329_s15 = scalar_lea.vmem %s446_s28, 32 }
 0x1d7   :  { %p326_p10 = scmp.ne.s32.totalorder %s446_s28, %s325_s14  ;;  %p330_p11 = scmp.lt.s32.totalorder %s446_s28, %s446_s28 }
 0x1d8   :  { %p331_p12 = scmp.lt.s32.totalorder %s329_s15, %s325_s14 }
 0x1da   :  { %p332_p13 = por %p331_p12, %p330_p11 }
 0x1dc   :  { %p333_p0 = pnand %p332_p13, %p326_p10 }
 0x1de   :  { %336 = shalt.err (!%p333_p0)
}
 0x1df   :  { %s337_s3 = scalar_lea.hbm %s484_s6, 16 }
 0x1e0   :  { %p338_p1 = scmp.ne.s32.totalorder %s484_s6, %s337_s3  ;;  %p341_p2 = scmp.lt.u32.totalorder %s337_s3, %s484_s6 }
 0x1e2   :  { %p343_p3 = pnand %p341_p2, %p338_p1 }
 0x1e4   :  { %346 = shalt.err (!%p343_p3)
}
 0x1e5   :  { %213 = dma.vmem_to_hbm [thread:$0]  %s446_s28, 16, %s484_s6, [#allocation7]  }
 0x1e6   :  { %349 = dma.done.wait [#allocation4], 128  }
 0x1e7   :  { %350 = vsyncadd [#allocation4], 4294967168 }
 0x1e8   :  { %351 = dma.done.wait [#allocation7], 32  }
 0x1e9   :  { %352 = vsyncadd [#allocation7], 4294967264 }
 0x1ea   :  { %223 = vsyncpa [#allocation3], 1 }
 0x1eb   :  { %224 = vsyncpa [#allocation4], 1 }
 0x1ec   :  { %225 = vsyncpa [#allocation7], 1 }

</bundles_post_ra>
